<compile_context>
chip_gen: v5e
topology: v5e:2x2
jax: 0.10.0
libtpu: 0.0.40
codegen_flags: <defaults>
</compile_context>

<pallas_src>
import functools

import jax
import jax.numpy as jnp
from jax import lax
from jax.experimental import pallas as pl
from jax.experimental.pallas import tpu as pltpu


def _round_up(v, m):
    return (v + m - 1) // m * m


def _center_loss_kernel(lab_ref, x_ref, c_ref, out_ref, *, batch, block_b,
                        num_classes):
    """One B-tile: one-hot MXU gather of own-class centers + VPU row distance.

    lab_ref : VMEM (TB, 1) int32   -- labels for this B-tile (pipelined)
    x_ref   : VMEM (TB, D) native  -- features for this B-tile (pipelined)
    c_ref   : VMEM (C, D)  native  -- class centers (resident, same block)
    out_ref : VMEM (1, 8, 128) f32 -- lane-dense, sublane-aligned partial sum
    """
    i = pl.program_id(0)
    base = i * block_b

    # --- one-hot gather of centers[labels] on the MXU ------------------------
    labels = lab_ref[...]                                              # (TB, 1)
    class_ids = lax.broadcasted_iota(jnp.int32, (block_b, num_classes), 1)
    onehot = (class_ids == labels).astype(c_ref.dtype)                 # (TB, C)
    gathered = jnp.dot(onehot, c_ref[...],
                       preferred_element_type=jnp.float32)             # (TB, D)

    # --- per-sample squared distance on the VPU -------------------------------
    xf = x_ref[...].astype(jnp.float32)
    diff = xf - gathered
    d = jnp.sum(diff * diff, axis=1, keepdims=True)                    # (TB, 1)
    d = jnp.clip(d, 1e-12, 1.0e12)                                     # clamp(dist[i, y_i])

    # Zero rows that lie beyond the real batch (ragged / OOB last tile).
    row_ids = base + lax.broadcasted_iota(jnp.int32, (block_b, 1), 0)
    d = jnp.where(row_ids < batch, d, 0.0)

    partial = jnp.sum(d)
    out_ref[...] = jnp.broadcast_to(partial, out_ref.shape).astype(out_ref.dtype)


def _vmem_bytes(tb, C, D, x_itemsize, c_itemsize):
    """Layout-padded VMEM footprint estimate (incl. default double buffering)."""
    lane = lambda d: max(_round_up(d, 128), 128)
    sub = lambda s: max(_round_up(s, 8), 8)
    return (
        2 * sub(tb) * lane(D) * x_itemsize      # x tiles (double buffered)
        + 2 * sub(tb) * 128 * 4                 # label tiles (i32, lane-padded)
        + 2 * sub(C) * lane(D) * c_itemsize     # centers (2 buffers by default)
        + sub(tb) * lane(C) * 4                 # one-hot intermediate
        + 2 * sub(tb) * lane(D) * 4             # gathered + diff f32 temps
        + 2 * 8 * 128 * 4                       # output tiles
    )


def center_loss(x, centers, labels, *, max_block_b=1024, interpret=False):
    """Pallas CenterLoss forward. x: (B, D), centers: (C, D), labels: (B,) int."""
    B, D = x.shape
    C, Dc = centers.shape
    assert D == Dc

    labels2d = labels.reshape(B, 1).astype(jnp.int32)
    x_isz = jnp.dtype(x.dtype).itemsize
    c_isz = jnp.dtype(centers.dtype).itemsize

    try:
        vmem_cap = int(pltpu.get_tpu_info().vmem_capacity_bytes)
    except Exception:  # interpret mode / non-TPU fallback
        vmem_cap = 64 * 1024 * 1024

    # B-tile size: multiple of 8 sublanes, big enough to sit near the HBM
    # roofline, small enough to (a) fit ~half of physical VMEM and (b) keep
    # >= 2 tiles when B allows so both TensorCores get grid work on v7x.
    tb = min(max_block_b, _round_up(B, 8))
    if B > 8:
        tb = min(tb, _round_up(pl.cdiv(B, 2), 8))
    budget = min(vmem_cap // 2, 96 * 1024 * 1024)
    while tb > 8 and _vmem_bytes(tb, C, D, x_isz, c_isz) > budget:
        tb = max(8, _round_up(tb // 2, 8))
    # TODO(synk): if C*D alone blows the budget (huge num_classes), keep centers
    # in HBM (memory_space=pl.ANY) and do chunked one-hot matmuls via a nested
    # emit_pipeline instead of a resident (C, D) block.

    num_tiles = pl.cdiv(B, tb)
    est = _vmem_bytes(tb, C, D, x_isz, c_isz)
    vmem_limit = int(min(vmem_cap, max(2 * est + (1 << 20), 32 * 1024 * 1024)))

    kernel = functools.partial(_center_loss_kernel,
                               batch=B, block_b=tb, num_classes=C)

    cost = pl.CostEstimate(
        flops=2 * B * C * D + 3 * B * D,          # one-hot matmul + diff/sq/sum
        transcendentals=0,
        bytes_accessed=B * D * x_isz + C * D * c_isz + B * 4
        + num_tiles * 8 * 128 * 4,
    )

    # TODO(synk): on v7x, mark the centers BlockSpec pipeline_mode=pl.Buffered(1)
    # (constant index_map -> no need to double-buffer) to halve its VMEM cost.
    partials = pl.pallas_call(
        kernel,
        out_shape=jax.ShapeDtypeStruct((num_tiles, 8, 128), jnp.float32),
        grid=(num_tiles,),
        in_specs=[
            pl.BlockSpec((tb, 1), lambda i: (i, 0)),    # labels tile, pipelined
            pl.BlockSpec((tb, D), lambda i: (i, 0)),    # x tile, pipelined
            pl.BlockSpec((C, D), lambda i: (0, 0)),     # centers, resident
        ],
        out_specs=pl.BlockSpec((1, 8, 128), lambda i: (i, 0, 0)),
        compiler_params=pltpu.CompilerParams(
            dimension_semantics=("parallel",),          # B-tiles shard across cores
            vmem_limit_bytes=vmem_limit,
        ),
        cost_estimate=cost,
        interpret=interpret,
    )(labels2d, x, centers)

    total = jnp.sum(partials[:, 0, 0])
    # clamp-after-mask semantics: each of the (C-1) masked-out columns per real
    # row contributes exactly 1e-12 to the reference sum.
    return (total + B * (C - 1) * 1e-12) / B


def center_loss_ref(x, centers, labels):
    """Pure-JAX reference mirroring the PyTorch forward."""
    B = x.shape[0]
    C = centers.shape[0]
    x = x.astype(jnp.float32)
    centers = centers.astype(jnp.float32)
    distmat = (
        jnp.sum(x ** 2, axis=1, keepdims=True)
        + jnp.sum(centers ** 2, axis=1, keepdims=True).T
        - 2.0 * x @ centers.T
    )
    mask = jax.nn.one_hot(labels, C, dtype=jnp.float32)
    dist = jnp.clip(distmat * mask, 1e-12, 1.0e12)
    return jnp.sum(dist) / B


if __name__ == "__main__":
    # Module defaults: num_classes=10; pick feat_dim=32, batch=8 (small shapes).
    num_classes = 10
    feat_dim = 32
    batch = 8

    key = jax.random.PRNGKey(0)
    k_x, k_c, k_l = jax.random.split(key, 3)

    # Deterministic "parameter" init (torch.randn equivalent) for centers.
    centers = jax.random.normal(k_c, (num_classes, feat_dim), dtype=jnp.float32)
    x = jax.random.normal(k_x, (batch, feat_dim), dtype=jnp.float32)
    labels = jax.random.randint(k_l, (batch,), 0, num_classes, dtype=jnp.int32)

    loss = jax.block_until_ready(center_loss(x, centers, labels))
    ref = jax.block_until_ready(center_loss_ref(x, centers, labels))
    assert jnp.allclose(loss, ref, rtol=1e-4, atol=1e-4), (loss, ref)

    print("KERNEL_OK")
</pallas_src>

<mosaic_0001>
module attributes {stable_mosaic.version = 11 : i64} {
  func.func @_center_loss_kernel(%arg0: i32, %arg1: memref<8x1xi32, #tpu.memory_space<vmem>>, %arg2: memref<8x32xf32, #tpu.memory_space<vmem>>, %arg3: memref<10x32xf32, #tpu.memory_space<vmem>>, %arg4: memref<1x8x128xf32, #tpu.memory_space<vmem>>) attributes {dimension_semantics = [#tpu.dimension_semantics<parallel>], iteration_bounds = array<i64: 1>, scalar_prefetch = 0 : i64, scratch_operands = 0 : i64, tpu.core_type = #tpu.core_type<tc>, window_params = [{transform_indices = @transform_0, window_bounds = array<i64: 8, 1>}, {transform_indices = @transform_1, window_bounds = array<i64: 8, 32>}, {pipeline_mode = #tpu.pipeline_mode<synchronous>, transform_indices = @transform_2, window_bounds = array<i64: 10, 32>}, {transform_indices = @transform_3, window_bounds = array<i64: 1, 8, 128>}]} {
    %c8_i32 = arith.constant 8 : i32
    %0 = arith.muli %arg0, %c8_i32 : i32
    %c0 = arith.constant 0 : index
    %c0_0 = arith.constant 0 : index
    %1 = vector.load %arg1[%c0, %c0_0] : memref<8x1xi32, #tpu.memory_space<vmem>>, vector<8x1xi32>
    %2 = tpu.iota {dimensions = array<i32: 1>} : vector<8x10xi32>
    %3 = vector.broadcast %1 : vector<8x1xi32> to vector<8x10xi32>
    %4 = arith.cmpi eq, %2, %3 : vector<8x10xi32>
    %5 = arith.extui %4 : vector<8x10xi1> to vector<8x10xi32>
    %6 = arith.sitofp %5 : vector<8x10xi32> to vector<8x10xf32>
    %c0_1 = arith.constant 0 : index
    %c0_2 = arith.constant 0 : index
    %7 = vector.load %arg3[%c0_1, %c0_2] : memref<10x32xf32, #tpu.memory_space<vmem>>, vector<10x32xf32>
    %cst = arith.constant dense<0.000000e+00> : vector<8x32xf32>
    %8 = tpu.matmul %6, %7, %cst {dimension_numbers = #tpu.dot_dimension_numbers<[1], [0], [0], [1], [0, 0, 1, 1], [], []>} : vector<8x10xf32>, vector<10x32xf32>, vector<8x32xf32> -> vector<8x32xf32>
    %c0_3 = arith.constant 0 : index
    %c0_4 = arith.constant 0 : index
    %9 = vector.load %arg2[%c0_3, %c0_4] : memref<8x32xf32, #tpu.memory_space<vmem>>, vector<8x32xf32>
    %10 = arith.subf %9, %8 : vector<8x32xf32>
    %11 = arith.mulf %10, %10 : vector<8x32xf32>
    %cst_5 = arith.constant dense<0.000000e+00> : vector<8xf32>
    %12 = vector.multi_reduction <add>, %11, %cst_5 [1] : vector<8x32xf32> to vector<8xf32>
    %13 = vector.shape_cast %12 : vector<8xf32> to vector<8x1xf32>
    %cst_6 = arith.constant 9.99999996E-13 : f32
    %cst_7 = arith.constant 9.99999995E+11 : f32
    %14 = vector.broadcast %cst_6 : f32 to vector<8x1xf32>
    %15 = arith.maximumf %14, %13 : vector<8x1xf32>
    %16 = vector.broadcast %cst_7 : f32 to vector<8x1xf32>
    %17 = arith.minimumf %16, %15 : vector<8x1xf32>
    %18 = tpu.iota {dimensions = array<i32: 0>} : vector<8x1xi32>
    %19 = vector.broadcast %0 : i32 to vector<8x1xi32>
    %20 = arith.addi %19, %18 : vector<8x1xi32>
    %c8_i32_8 = arith.constant 8 : i32
    %21 = vector.broadcast %c8_i32_8 : i32 to vector<8x1xi32>
    %22 = arith.cmpi slt, %20, %21 : vector<8x1xi32>
    %cst_9 = arith.constant 0.000000e+00 : f32
    %23 = vector.broadcast %cst_9 : f32 to vector<8x1xf32>
    %24 = arith.select %22, %17, %23 : vector<8x1xi1>, vector<8x1xf32>
    %25 = vector.shape_cast %24 : vector<8x1xf32> to vector<1x8x1xf32>
    %cst_10 = arith.constant dense<0.000000e+00> : vector<1xf32>
    %26 = vector.multi_reduction <add>, %25, %cst_10 [1, 2] : vector<1x8x1xf32> to vector<1xf32>
    %27 = vector.shape_cast %26 : vector<1xf32> to vector<1x1x1xf32>
    %28 = vector.extract %27[0, 0, 0] : f32 from vector<1x1x1xf32>
    %29 = vector.broadcast %28 : f32 to vector<1x8x128xf32>
    %c0_11 = arith.constant 0 : index
    %c0_12 = arith.constant 0 : index
    %c0_13 = arith.constant 0 : index
    %30 = vector.load %arg4[%c0_11, %c0_12, %c0_13] : memref<1x8x128xf32, #tpu.memory_space<vmem>>, vector<1x8x128xf32>
    tpu.vector_store %arg4[%c0_11, %c0_12, %c0_13], %29 {strides = array<i32>} : memref<1x8x128xf32, #tpu.memory_space<vmem>>, vector<1x8x128xf32>,
    return
  }
  func.func @transform_0(%arg0: i32) -> (i32, i32) {
    %c0_i32 = arith.constant 0 : i32
    %c0_i32_0 = arith.constant 0 : i32
    return %arg0, %c0_i32 : i32, i32
  }
  func.func @transform_1(%arg0: i32) -> (i32, i32) {
    %c0_i32 = arith.constant 0 : i32
    %c0_i32_0 = arith.constant 0 : i32
    return %arg0, %c0_i32 : i32, i32
  }
  func.func @transform_2(%arg0: i32) -> (i32, i32) {
    %c0_i32 = arith.constant 0 : i32
    %c0_i32_0 = arith.constant 0 : i32
    %c0_i32_1 = arith.constant 0 : i32
    return %c0_i32, %c0_i32_0 : i32, i32
  }
  func.func @transform_3(%arg0: i32) -> (i32, i32, i32) {
    %c0_i32 = arith.constant 0 : i32
    %c0_i32_0 = arith.constant 0 : i32
    %c0_i32_1 = arith.constant 0 : i32
    return %arg0, %c0_i32, %c0_i32_0 : i32, i32, i32
  }
}

</mosaic_0001>

<bundles_post_ra>
// kernel: tpu_custom_call.1
= control target key start
LH: loop header
LB: loop body
LE: loop exit
PB: predicated region body
PF: predicated region fallthrough
CT: control target
= control target key end

     0   :  { %8 = vsyncpa [#allocation3], 0  ;;  %s218_s0 = inlined_call_operand.vmem [shape: s32[8,1], index: 0, kind: input, shape index: {}]   ;;  %s219_s1 = inlined_call_operand.vmem [shape: f32[8,32], index: 1, kind: input, shape index: {}]   ;;  %s220_s2 = inlined_call_operand.hbm [shape: f32[10,32], index: 2, kind: input, shape index: {}]   ;;  %s221_s3 = inlined_call_operand.hbm [shape: f32[1,8,128], index: 3, kind: output, shape index: {}]  }
   0x1   :  { %9 = vsyncpa [#allocation4], 0  ;;  %s18_s14 = sshll.u32 %s220_s2, 4  ;;  %s180_s15 = smov [#allocation2]   ;;  %s19_s14 = int_to_ptr.hbm [resolvable:$true] %s18_s14 }
   0x2   :  { %s20_s16 = sshll.u32 %s180_s15, 4  ;;  %s181_s17 = smov 128   ;;  %s21_s16 = int_to_ptr.vmem [resolvable:$true] %s20_s16 }
   0x3   :  { %s182_s18 = smov 8  }
   0x4   :  { %26 = dma.hbm_to_vmem [thread:$0]  %s19_s14, 256, %s21_s16, [#allocation3], %s181_s17, %s181_s17, %s182_s18  }
   0x5   :  { %176 = dma.done.wait [#allocation3], 256  }
   0x6   :  { %177 = vsyncadd [#allocation3], 4294967040  ;;  %v183_v0 = vmov 0   ;;  %vm47_vm0 = vcmask 1041408   ;;  %v32_v1 = vld [vmem:[%s218_s0] sm:$0xff]  ;;  %v33_v4 = vlaneseq  ;;  %vm43_vm1 = vcmask 80896  }
   0x7   :  { %127 = vset.pattern.permute.xlu0 %v183_v0  ;;  %v42_v2 = vld [vmem:[#allocation2 + $0x8] sm:$0x3]  ;;  %v41_v3 = vld [vmem:[#allocation2] sm:$0xff]  ;;  %v184_v7 = vmov 0.0   ;;  %vm74_vm3 = vcmask 261120   ;;  %vm86_vm4 = vcmask 7168  }
   0x8   :  { %36 = vperm.xlu0 %127, %v32_v1   ;;  %117 = vmatpush.msk.msra.mxu0 %vm47_vm0, %v42_v2  ;;  %v34_v5 = vand.u32 127, %v33_v4  ;;  %v71_v9 = vld [vmem:[%s219_s1] sm:$0xff]  ;;  %s185_s0 = smov [#allocation5]   ;;  %s106_s24 = sshll.u32 %s221_s3, 4  ;;  %s107_s24 = int_to_ptr.hbm [resolvable:$true] %s106_s24 }
   0x9   :  { %s104_s1 = sshll.u32 %s185_s0, 4  ;;  %s105_s1 = int_to_ptr.vmem [resolvable:$true] %s104_s1 }
   0xa   :  { %66 = vmatpush.msra.mxu0 %v41_v3 }
  0x7a   :  { %v37_v6 = vpop.permute.xlu0 %36 }
  0x7b   :  { %vm38_vm2 = vcmp.eq.s32.totalorder %v34_v5, %v37_v6 }
  0x7c   :  { %v116_v8 = vsel %vm38_vm2, 1.0, %v184_v7 }
  0x7d   :  { %118 = vmatmul.msk.f32.vlgmr.msra.gmra.mxu0 %vm43_vm1, %v116_v8 }
  0xfa   :  { %v68_v10 = vpop.f32.mrf.mxu0 }
  0xfb   :  { %v72_v11 = vsub.f32 %v71_v9, %v68_v10 }
  0xfd   :  { %v73_v12 = vmul.f32 %v72_v11, %v72_v11 }
  0xff   :  { %v75_v13 = vsel %vm74_vm3, %v73_v12, 0.0 }
 0x100   :  { %76 = vadd.xlane.f32.xlu0 %v75_v13 }
 0x173   :  { %v77_v14 = vpop.xlane.xlu0 %76 }
 0x174   :  { %v78_v15 = vmax.f32 %v77_v14, 1e-12 }
 0x176   :  { %v79_v16 = vmin.f32 %v78_v15, 1e+12 }
 0x178   :  { %v87_v17 = vsel %vm86_vm4, %v79_v16, 0.0 }
 0x179   :  { %88 = vadd.xlane.f32.xlu1 %v87_v17 }
 0x1ec   :  { %v89_v18 = vpop.xlane.xlu1 %88 }
 0x1ed   :  { %v90_v19 = vrot.slane %v89_v18, 4 }
 0x1ef   :  { %v91_v20 = vadd.f32 %v90_v19, %v89_v18 }
 0x1f1   :  { %v92_v21 = vrot.slane %v91_v20, 2 }
 0x1f3   :  { %v93_v22 = vadd.f32 %v92_v21, %v91_v20 }
 0x1f5   :  { %v94_v23 = vrot.slane %v93_v22, 1 }
 0x1f7   :  { %v95_v24 = vadd.f32 %v94_v23, %v93_v22 }
 0x1f9   :  { %119 = vpush %v95_v24 }
 0x22a   :  { %s120_s25 = spop %119 }
 0x22b   :  { %v97_v25 = vstv %s120_s25 }
 0x22c   :  { %98 = vst [vmem:[#allocation5] sm:$0xff] %v97_v25 }
 0x22d   :  { %109 = dma.vmem_to_hbm [thread:$0]  %s105_s1, 128, %s107_s24, [#allocation4]  }
 0x22e   :  { %178 = dma.done.wait [#allocation4], 128  }
 0x22f   :  { %179 = vsyncadd [#allocation4], 4294967168 }
 0x230   :  { %114 = vsyncpa [#allocation3], 1 }
 0x231   :  { %115 = vsyncpa [#allocation4], 1 }

</bundles_post_ra>
